<compile_context>
chip_gen: v7x
topology: tpu7x:2x2x1
jax: 0.10.0
libtpu: 0.0.40
codegen_flags: <defaults>
</compile_context>

<pallas_src>
import functools

import jax
import jax.numpy as jnp
from jax.experimental import pallas as pl
from jax.experimental.pallas import tpu as pltpu

EPS = 1e-5
NEG_SLOPE = 0.2


def _round_up(x, m):
    return (x + m - 1) // m * m


def _pick_tile(dim, target, prefer_two_tiles=False):
    """Lane-aligned tile (multiple of 128, <= target) minimizing padding waste.

    Tie-breaks: prefer >=2 tiles along the dim (megacore on v7x), then the
    larger tile (fewer grid steps)."""
    aligned = _round_up(dim, 128)
    cap = max(128, min(_round_up(target, 128), aligned))
    best_key, best = None, 128
    for c in range(128, cap + 1, 128):
        padded = _round_up(dim, c)
        waste = padded - dim
        ntiles = padded // c
        multi_penalty = 0 if (not prefer_two_tiles or ntiles >= 2) else 1
        key = (waste, multi_penalty, -c)
        if best_key is None or key < best_key:
            best_key, best = key, c
    return best


def _linear_unit_kernel(x_ref, w_ref, b_ref, g_ref, beta_ref, o_ref, acc_ref,
                        *, tk, x_resident):
    k = pl.program_id(1)

    @pl.when(k == 0)
    def _():
        acc_ref[...] = jnp.zeros_like(acc_ref)

    if x_resident:
        # x is resident in VMEM (constant block index -> DMA'd once); take the
        # current K slice.  Start is a multiple of TK (itself a multiple of 128).
        start = pl.multiple_of(k * tk, tk)
        a = x_ref[:, pl.ds(start, tk)]
    else:
        a = x_ref[...]

    # (B, TK) . (TN, TK)^T  -> (B, TN); operands already in matmul dtype,
    # f32 accumulation on the MXU; no per-tile casts, no transpose.
    acc_ref[...] += jax.lax.dot_general(
        a, w_ref[...],
        dimension_numbers=(((1,), (1,)), ((), ())),
        preferred_element_type=jnp.float32)

    @pl.when(k == pl.num_programs(1) - 1)
    def _():
        # Epilogue: bias + training-mode BatchNorm1d (biased variance over
        # batch) + LeakyReLU.  Runs on VPU/XLU/EUP slots, hidden under MXU work.
        h = acc_ref[...] + b_ref[...].astype(jnp.float32)
        mean = jnp.mean(h, axis=0, keepdims=True)
        centered = h - mean
        var = jnp.mean(centered * centered, axis=0, keepdims=True)
        inv_std = jax.lax.rsqrt(var + EPS)
        hn = (centered * inv_std * g_ref[...].astype(jnp.float32)
              + beta_ref[...].astype(jnp.float32))
        y = jnp.where(hn > 0, hn, NEG_SLOPE * hn)
        o_ref[...] = y.astype(o_ref.dtype)


def linear_unit(x, weight, bias, gamma, beta, *,
                matmul_dtype=jnp.bfloat16, out_dtype=None,
                tn_target=512, tk_target=1024):
    """x: (B, Din); weight: (Dout, Din) (PyTorch layout, NOT transposed);
    bias/gamma/beta: (Dout,).  Returns (B, Dout) in out_dtype (default x.dtype).

    For peak performance pass `weight` already stored in `matmul_dtype`
    (persistent bf16 params) -- the wrapper cast is then a no-op and weight
    HBM traffic is halved.  Use matmul_dtype=jnp.float32 as a precision
    escape hatch for very large Din."""
    B, Din = x.shape
    Dout, Din_w = weight.shape
    assert Din_w == Din
    out_dtype = x.dtype if out_dtype is None else out_dtype

    mm_bytes = jnp.dtype(matmul_dtype).itemsize
    out_bytes = jnp.dtype(out_dtype).itemsize

    # ---- chip-aware VMEM ceiling (v7x has only 64 MiB per TensorCore). ----
    try:
        vmem_cap = int(pltpu.get_tpu_info().vmem_capacity_bytes)
    except Exception:  # pragma: no cover - conservative fallback
        vmem_cap = 64 << 20
    usable = max((vmem_cap * 3) // 4, 16 << 20)

    # ---- padding-aware tile selection. ----
    TN = _pick_tile(Dout, tn_target, prefer_two_tiles=True)
    TK = _pick_tile(Din, tk_target)

    def vmem_budget(tn, tk, resident, w_bufs):
        din_p = _round_up(Din, tk)
        x_term = 2 * B * (din_p if resident else tk) * mm_bytes
        return (x_term + w_bufs * tn * tk * mm_bytes
                + 2 * B * tn * out_bytes         # double-buffered output tile
                + B * tn * 4                     # f32 accumulator scratch
                + 3 * 2 * tn * 4)                # bias/gamma/beta tiles

    # Shrink tiles if even the streaming-x configuration would not fit.
    while TK > 128 and vmem_budget(TN, TK, False, 2) > usable:
        TK -= 128
    while TN > 128 and vmem_budget(TN, TK, False, 2) > usable:
        TN -= 128
    if vmem_budget(TN, TK, False, 2) > usable:
        # TODO(synk): fall back to a two-pass / Welford-streaming BatchNorm
        # that tiles the batch dimension instead of failing.
        raise ValueError("Batch too large for single-pass BatchNorm kernel "
                         "within the VMEM budget.")

    Dout_p = _round_up(Dout, TN)
    Din_p = _round_up(Din, TK)
    n_k = Din_p // TK

    # Prefer resident x (no re-streaming per n tile), then a 3-deep weight
    # pipeline when the K loop is long enough to benefit.
    if vmem_budget(TN, TK, True, 3 if n_k >= 3 else 2) <= usable:
        x_resident, w_bufs = True, (3 if n_k >= 3 else 2)
    elif vmem_budget(TN, TK, True, 2) <= usable:
        x_resident, w_bufs = True, 2
    elif n_k >= 3 and vmem_budget(TN, TK, False, 3) <= usable:
        x_resident, w_bufs = False, 3
    else:
        x_resident, w_bufs = False, 2
    budget = vmem_budget(TN, TK, x_resident, w_bufs)

    # ---- casts + zero padding (padded features come out 0, sliced away). ----
    x_p = x.astype(matmul_dtype)
    if Din_p != Din:
        x_p = jnp.pad(x_p, ((0, 0), (0, Din_p - Din)))
    w_p = weight.astype(matmul_dtype)   # no-op if weight is stored in bf16
    if (Dout_p, Din_p) != (Dout, Din):
        w_p = jnp.pad(w_p, ((0, Dout_p - Dout), (0, Din_p - Din)))

    def _pad_vec(v):
        v = v.reshape(1, Dout).astype(jnp.float32)
        return v if Dout_p == Dout else jnp.pad(v, ((0, 0), (0, Dout_p - Dout)))

    b2 = _pad_vec(bias)
    g2 = _pad_vec(gamma)
    be2 = _pad_vec(beta)

    grid = (Dout_p // TN, n_k)

    if x_resident:
        x_spec = pl.BlockSpec((B, Din_p), lambda n, k: (0, 0))
    else:
        x_spec = pl.BlockSpec((B, TK), lambda n, k: (0, k))
    if w_bufs == 3:
        w_spec = pl.BlockSpec((TN, TK), lambda n, k: (n, k),
                              pipeline_mode=pl.Buffered(3))
    else:
        w_spec = pl.BlockSpec((TN, TK), lambda n, k: (n, k))

    vmem_limit = int(min(max(budget * 5 // 4 + (2 << 20), 16 << 20), usable))

    x_reads = 1 if x_resident else (Dout_p // TN)
    cost = pl.CostEstimate(
        flops=2 * B * Din_p * Dout_p + 10 * B * Dout_p,
        transcendentals=Dout_p,
        bytes_accessed=(x_reads * B * Din_p * mm_bytes
                        + Dout_p * Din_p * mm_bytes
                        + B * Dout_p * out_bytes + 3 * Dout_p * 4))

    out_p = pl.pallas_call(
        functools.partial(_linear_unit_kernel, tk=TK, x_resident=x_resident),
        out_shape=jax.ShapeDtypeStruct((B, Dout_p), out_dtype),
        grid=grid,
        in_specs=[
            x_spec,                                        # x
            w_spec,                                        # weight (Dout, Din)
            pl.BlockSpec((1, TN), lambda n, k: (0, n)),    # bias
            pl.BlockSpec((1, TN), lambda n, k: (0, n)),    # gamma
            pl.BlockSpec((1, TN), lambda n, k: (0, n)),    # beta
        ],
        out_specs=pl.BlockSpec((B, TN), lambda n, k: (0, n)),
        scratch_shapes=[pltpu.VMEM((B, TN), jnp.float32)],
        compiler_params=pltpu.CompilerParams(
            dimension_semantics=("parallel", "arbitrary"),
            vmem_limit_bytes=vmem_limit),
        cost_estimate=cost,
    )(x_p, w_p, b2, g2, be2)

    return out_p[:, :Dout] if Dout_p != Dout else out_p


def reference(x, weight, bias, gamma, beta):
    h = x @ weight.T + bias
    mean = h.mean(axis=0, keepdims=True)
    var = ((h - mean) ** 2).mean(axis=0, keepdims=True)
    hn = (h - mean) / jnp.sqrt(var + EPS) * gamma + beta
    return jnp.where(hn > 0, hn, NEG_SLOPE * hn)


if __name__ == "__main__":
    key = jax.random.PRNGKey(0)
    B, Din, Dout = 8, 32, 64

    kx, kw, kb = jax.random.split(key, 3)
    x = jax.random.normal(kx, (B, Din), dtype=jnp.float32)

    # nn.Linear default init: U(-1/sqrt(Din), 1/sqrt(Din)); BN affine init 1/0.
    bound = 1.0 / jnp.sqrt(jnp.float32(Din))
    weight = jax.random.uniform(kw, (Dout, Din), minval=-bound, maxval=bound,
                                dtype=jnp.float32)
    bias = jax.random.uniform(kb, (Dout,), minval=-bound, maxval=bound,
                              dtype=jnp.float32)
    gamma = jnp.ones((Dout,), jnp.float32)
    beta = jnp.zeros((Dout,), jnp.float32)

    # Persistent bf16 weight (done once at "load time", not per call).
    w_bf16 = weight.astype(jnp.bfloat16)

    out = linear_unit(x, w_bf16, bias, gamma, beta)
    jax.block_until_ready(out)

    ref = reference(x, w_bf16.astype(jnp.float32), bias, gamma, beta)
    assert out.shape == (B, Dout)
    # bf16 matmul operands (f32 accumulation + f32 BN) -> loose-ish tolerance.
    assert jnp.allclose(out, ref, atol=2e-2, rtol=2e-2), (
        float(jnp.max(jnp.abs(out - ref))))
    print("KERNEL_OK")
</pallas_src>

<mosaic_0001>
module attributes {stable_mosaic.version = 11 : i64} {
  func.func @_linear_unit_kernel(%arg0: i32, %arg1: i32, %arg2: memref<8x128xbf16, #tpu.memory_space<vmem>>, %arg3: memref<128x128xbf16, #tpu.memory_space<vmem>>, %arg4: memref<1x128xf32, #tpu.memory_space<vmem>>, %arg5: memref<1x128xf32, #tpu.memory_space<vmem>>, %arg6: memref<1x128xf32, #tpu.memory_space<vmem>>, %arg7: memref<8x128xf32, #tpu.memory_space<vmem>>, %arg8: memref<8x128xf32, #tpu.memory_space<vmem>>) attributes {dimension_semantics = [#tpu.dimension_semantics<parallel>, #tpu.dimension_semantics<arbitrary>], iteration_bounds = array<i64: 1, 1>, scalar_prefetch = 0 : i64, scratch_operands = 1 : i64, tpu.core_type = #tpu.core_type<tc>, window_params = [{pipeline_mode = #tpu.pipeline_mode<synchronous>, transform_indices = @transform_0, window_bounds = array<i64: 8, 128>}, {transform_indices = @transform_1, window_bounds = array<i64: 128, 128>}, {transform_indices = @transform_2, window_bounds = array<i64: 1, 128>}, {transform_indices = @transform_3, window_bounds = array<i64: 1, 128>}, {transform_indices = @transform_4, window_bounds = array<i64: 1, 128>}, {transform_indices = @transform_5, window_bounds = array<i64: 8, 128>}]} {
    %c0_i32 = arith.constant 0 : i32
    %0 = arith.cmpi eq, %arg1, %c0_i32 : i32
    %1 = arith.extui %0 : i1 to i32
    %c0_i32_0 = arith.constant 0 : i32
    %2 = arith.cmpi ne, %1, %c0_i32_0 : i32
    scf.if %2 {
      %cst_9 = arith.constant 0.000000e+00 : f32
      %15 = vector.broadcast %cst_9 : f32 to vector<8x128xf32>
      %c0_10 = arith.constant 0 : index
      %c0_11 = arith.constant 0 : index
      %16 = vector.load %arg8[%c0_10, %c0_11] : memref<8x128xf32, #tpu.memory_space<vmem>>, vector<8x128xf32>
      tpu.vector_store %arg8[%c0_10, %c0_11], %15 {strides = array<i32>} : memref<8x128xf32, #tpu.memory_space<vmem>>, vector<8x128xf32>,
    } else {
    }
    %c128_i32 = arith.constant 128 : i32
    %3 = arith.muli %arg1, %c128_i32 : i32
    %4 = tpu.assume_multiple %3, 128 : i32
    %c0 = arith.constant 0 : index
    %5 = arith.index_cast %4 : i32 to index
    %6 = vector.load %arg2[%c0, %5] : memref<8x128xbf16, #tpu.memory_space<vmem>>, vector<8x128xbf16>
    %c0_1 = arith.constant 0 : index
    %c0_2 = arith.constant 0 : index
    %7 = vector.load %arg8[%c0_1, %c0_2] : memref<8x128xf32, #tpu.memory_space<vmem>>, vector<8x128xf32>
    %c0_3 = arith.constant 0 : index
    %c0_4 = arith.constant 0 : index
    %8 = vector.load %arg3[%c0_3, %c0_4] : memref<128x128xbf16, #tpu.memory_space<vmem>>, vector<128x128xbf16>
    %cst = arith.constant dense<0.000000e+00> : vector<8x128xf32>
    %9 = tpu.matmul %6, %8, %cst {dimension_numbers = #tpu.dot_dimension_numbers<[1], [1], [0], [0], [0, 0, 1, 0], [], []>} : vector<8x128xbf16>, vector<128x128xbf16>, vector<8x128xf32> -> vector<8x128xf32>
    %10 = arith.addf %7, %9 : vector<8x128xf32>
    %c0_5 = arith.constant 0 : index
    %c0_6 = arith.constant 0 : index
    %11 = vector.load %arg8[%c0_5, %c0_6] : memref<8x128xf32, #tpu.memory_space<vmem>>, vector<8x128xf32>
    tpu.vector_store %arg8[%c0_5, %c0_6], %10 {strides = array<i32>} : memref<8x128xf32, #tpu.memory_space<vmem>>, vector<8x128xf32>,
    %c0_i32_7 = arith.constant 0 : i32
    %12 = arith.cmpi eq, %arg1, %c0_i32_7 : i32
    %13 = arith.extui %12 : i1 to i32
    %c0_i32_8 = arith.constant 0 : i32
    %14 = arith.cmpi ne, %13, %c0_i32_8 : i32
    scf.if %14 {
      %c0_9 = arith.constant 0 : index
      %c0_10 = arith.constant 0 : index
      %15 = vector.load %arg8[%c0_9, %c0_10] : memref<8x128xf32, #tpu.memory_space<vmem>>, vector<8x128xf32>
      %c0_11 = arith.constant 0 : index
      %c0_12 = arith.constant 0 : index
      %16 = vector.load %arg4[%c0_11, %c0_12] : memref<1x128xf32, #tpu.memory_space<vmem>>, vector<1x128xf32>
      %17 = vector.broadcast %16 : vector<1x128xf32> to vector<8x128xf32>
      %18 = arith.addf %15, %17 : vector<8x128xf32>
      %cst_13 = arith.constant dense<0.000000e+00> : vector<128xf32>
      %19 = vector.multi_reduction <add>, %18, %cst_13 [0] : vector<8x128xf32> to vector<128xf32>
      %20 = vector.shape_cast %19 : vector<128xf32> to vector<1x128xf32>
      %cst_14 = arith.constant 8.000000e+00 : f32
      %21 = vector.broadcast %cst_14 : f32 to vector<1x128xf32>
      %22 = arith.divf %20, %21 : vector<1x128xf32>
      %23 = vector.broadcast %22 : vector<1x128xf32> to vector<8x128xf32>
      %24 = arith.subf %18, %23 : vector<8x128xf32>
      %25 = arith.mulf %24, %24 : vector<8x128xf32>
      %cst_15 = arith.constant dense<0.000000e+00> : vector<128xf32>
      %26 = vector.multi_reduction <add>, %25, %cst_15 [0] : vector<8x128xf32> to vector<128xf32>
      %27 = vector.shape_cast %26 : vector<128xf32> to vector<1x128xf32>
      %cst_16 = arith.constant 8.000000e+00 : f32
      %28 = vector.broadcast %cst_16 : f32 to vector<1x128xf32>
      %29 = arith.divf %27, %28 : vector<1x128xf32>
      %cst_17 = arith.constant 9.99999974E-6 : f32
      %30 = vector.broadcast %cst_17 : f32 to vector<1x128xf32>
      %31 = arith.addf %29, %30 : vector<1x128xf32>
      %32 = math.rsqrt %31 : vector<1x128xf32>
      %33 = vector.broadcast %32 : vector<1x128xf32> to vector<8x128xf32>
      %34 = arith.mulf %24, %33 : vector<8x128xf32>
      %c0_18 = arith.constant 0 : index
      %c0_19 = arith.constant 0 : index
      %35 = vector.load %arg5[%c0_18, %c0_19] : memref<1x128xf32, #tpu.memory_space<vmem>>, vector<1x128xf32>
      %36 = vector.broadcast %35 : vector<1x128xf32> to vector<8x128xf32>
      %37 = arith.mulf %34, %36 : vector<8x128xf32>
      %c0_20 = arith.constant 0 : index
      %c0_21 = arith.constant 0 : index
      %38 = vector.load %arg6[%c0_20, %c0_21] : memref<1x128xf32, #tpu.memory_space<vmem>>, vector<1x128xf32>
      %39 = vector.broadcast %38 : vector<1x128xf32> to vector<8x128xf32>
      %40 = arith.addf %37, %39 : vector<8x128xf32>
      %cst_22 = arith.constant 0.000000e+00 : f32
      %41 = vector.broadcast %cst_22 : f32 to vector<8x128xf32>
      %42 = arith.cmpf ogt, %40, %41 : vector<8x128xf32>
      %cst_23 = arith.constant 2.000000e-01 : f32
      %43 = vector.broadcast %cst_23 : f32 to vector<8x128xf32>
      %44 = arith.mulf %43, %40 : vector<8x128xf32>
      %45 = arith.select %42, %40, %44 : vector<8x128xi1>, vector<8x128xf32>
      %c0_24 = arith.constant 0 : index
      %c0_25 = arith.constant 0 : index
      %46 = vector.load %arg7[%c0_24, %c0_25] : memref<8x128xf32, #tpu.memory_space<vmem>>, vector<8x128xf32>
      tpu.vector_store %arg7[%c0_24, %c0_25], %45 {strides = array<i32>} : memref<8x128xf32, #tpu.memory_space<vmem>>, vector<8x128xf32>,
    } else {
    }
    return
  }
  func.func @transform_0(%arg0: i32, %arg1: i32) -> (i32, i32) {
    %c0_i32 = arith.constant 0 : i32
    %c0_i32_0 = arith.constant 0 : i32
    %c0_i32_1 = arith.constant 0 : i32
    return %c0_i32, %c0_i32_0 : i32, i32
  }
  func.func @transform_1(%arg0: i32, %arg1: i32) -> (i32, i32) {
    %c0_i32 = arith.constant 0 : i32
    return %arg0, %arg1 : i32, i32
  }
  func.func @transform_2(%arg0: i32, %arg1: i32) -> (i32, i32) {
    %c0_i32 = arith.constant 0 : i32
    %c0_i32_0 = arith.constant 0 : i32
    return %c0_i32, %arg0 : i32, i32
  }
  func.func @transform_3(%arg0: i32, %arg1: i32) -> (i32, i32) {
    %c0_i32 = arith.constant 0 : i32
    %c0_i32_0 = arith.constant 0 : i32
    return %c0_i32, %arg0 : i32, i32
  }
  func.func @transform_4(%arg0: i32, %arg1: i32) -> (i32, i32) {
    %c0_i32 = arith.constant 0 : i32
    %c0_i32_0 = arith.constant 0 : i32
    return %c0_i32, %arg0 : i32, i32
  }
  func.func @transform_5(%arg0: i32, %arg1: i32) -> (i32, i32) {
    %c0_i32 = arith.constant 0 : i32
    %c0_i32_0 = arith.constant 0 : i32
    return %c0_i32, %arg0 : i32, i32
  }
}

</mosaic_0001>

<bundles_post_ra>
// kernel: tpu_custom_call.1
= control target key start
LH: loop header
LB: loop body
LE: loop exit
PB: predicated region body
PF: predicated region fallthrough
CT: control target
= control target key end

     0   :  { %10 = vsyncpa [#allocation4], 0  ;;  %s454_s0 = inlined_call_operand.hbm [shape: bf16[8,128], index: 0, kind: input, shape index: {}]   ;;  %s455_s1 = inlined_call_operand.hbm [shape: bf16[128,128], index: 1, kind: input, shape index: {}]   ;;  %s456_s2 = inlined_call_operand.vmem [shape: f32[1,128], index: 2, kind: input, shape index: {}]   ;;  %s457_s3 = inlined_call_operand.vmem [shape: f32[1,128], index: 3, kind: input, shape index: {}]   ;;  %s458_s4 = inlined_call_operand.vmem [shape: f32[1,128], index: 4, kind: input, shape index: {}]   ;;  %s459_s5 = inlined_call_operand.hbm [shape: f32[8,128], index: 5, kind: output, shape index: {}]  }
   0x1   :  { %11 = vsyncpa [#allocation7], 0 }
   0x2   :  { %12 = vsyncpa [#allocation5], 0  ;;  %s365_s18 = smov [#allocation3]   ;;  %s366_s20 = smov [#allocation6]  }
   0x3   :  { %s19_s19 = sshll.u32 %s365_s18, 4  ;;  %s28_s21 = sshll.u32 %s366_s20, 4  ;;  %s20_s19 = int_to_ptr.vmem [resolvable:$true] %s19_s19  ;;  %s402_s21 = int_to_ptr.vmem [resolvable:$true] %s28_s21 }
   0x4   :  { %s293_s24 = scalar_lea.hbm %s454_s0, 64 }
   0x5   :  { %p294_p0 = scmp.ne.s32.totalorder %s454_s0, %s293_s24  ;;  %p297_p1 = scmp.lt.u32.totalorder %s293_s24, %s454_s0 }
   0x7   :  { %p299_p2 = pnand %p297_p1, %p294_p0 }
   0x9   :  { %302 = shalt.err (!%p299_p2)
}
   0xa   :  { %s303_s29 = scalar_lea.vmem %s20_s19, 64  ;;  %p308_p4 = scmp.lt.s32.totalorder %s20_s19, %s20_s19 }
   0xb   :  { %p304_p3 = scmp.ne.s32.totalorder %s20_s19, %s303_s29  ;;  %p309_p5 = scmp.lt.s32.totalorder %s303_s29, %s303_s29 }
   0xd   :  { %p310_p6 = por %p309_p5, %p308_p4 }
   0xf   :  { %p311_p7 = pnand %p310_p6, %p304_p3 }
  0x11   :  { %314 = shalt.err (!%p311_p7)
}
  0x12   :  { %22 = dma.hbm_to_vmem [thread:$0]  %s454_s0, 64, %s20_s19, [#allocation4]  }
  0x13   :  { %s315_s9 = scalar_lea.hbm %s455_s1, 1024 }
  0x14   :  { %p316_p8 = scmp.ne.s32.totalorder %s455_s1, %s315_s9  ;;  %p319_p9 = scmp.lt.u32.totalorder %s315_s9, %s455_s1 }
  0x16   :  { %p321_p10 = pnand %p319_p9, %p316_p8 }
  0x18   :  { %324 = shalt.err (!%p321_p10)
}
  0x19   :  { %s325_s14 = scalar_lea.vmem %s402_s21, 1024  ;;  %p330_p12 = scmp.lt.s32.totalorder %s402_s21, %s402_s21 }
  0x1a   :  { %p326_p11 = scmp.ne.s32.totalorder %s402_s21, %s325_s14  ;;  %p331_p13 = scmp.lt.s32.totalorder %s325_s14, %s325_s14 }
  0x1c   :  { %p332_p0 = por %p331_p13, %p330_p12 }
  0x1e   :  { %p333_p1 = pnand %p332_p0, %p326_p11 }
  0x20   :  { %336 = shalt.err (!%p333_p1)
}
  0x21   :  { %s367_s0 = smov 64   ;;  %s368_s15 = smov 4  }
  0x22   :  { %34 = dma.hbm_to_vmem [thread:$0]  %s455_s1, 1024, %s402_s21, [#allocation7], %s367_s0, %s367_s0, %s368_s15  }
  0x23   :  { %359 = dma.done.wait [#allocation4], 64  }
  0x24   :  { %360 = vsyncadd [#allocation4], 4294967232 }
  0x25   :  { %361 = dma.done.wait [#allocation7], 1024  }
  0x26   :  { %362 = vsyncadd [#allocation7], 4294966272  ;;  %v369_v0 = vmov 0.0   ;;  %vm370_vm0 = vmmov 0   ;;  %v283_v1 = vld [vmem:[#allocation6] sm:$0xff]   ;;  %v284_v2 = vld [vmem:[#allocation6 + $0x8] sm:$0xff]  }
  0x27   :  { %256 = vmatprep.subr.bf16.mxu0 %v369_v0  ;;  %272 = vmatprep.mubr.msk.bf16.mxu0 %vm370_vm0, %v369_v0  ;;  %v285_v3 = vld [vmem:[#allocation6 + $0x10] sm:$0xff]   ;;  %v286_v4 = vld [vmem:[#allocation6 + $0x18] sm:$0xff]   ;;  %v287_v5 = vld [vmem:[#allocation6 + $0x20] sm:$0xff]   ;;  %s371_s22 = smov [#allocation8]  }
  0x28   :  { %257 = vmatpush3.bf16.xpose.msra.mxu0 %v283_v1  ;;  %v288_v6 = vld [vmem:[#allocation6 + $0x28] sm:$0xff]   ;;  %v289_v7 = vld [vmem:[#allocation6 + $0x30] sm:$0xff]   ;;  %v290_v8 = vld [vmem:[#allocation6 + $0x38] sm:$0xff]   ;;  %s224_s23 = sshll.u32 %s371_s22, 4  ;;  %s225_s23 = int_to_ptr.vmem [resolvable:$true] %s224_s23 }
  0x29   :  { %258 = vmatprep.subr.bf16.mxu0 %v369_v0  ;;  %v58_v9 = vld [vmem:[#allocation3] sm:$0xf]  ;;  %s337_s24 = scalar_lea.vmem %s225_s23, 128  ;;  %p342_p3 = scmp.lt.s32.totalorder %s225_s23, %s225_s23 }
  0x2a   :  { %v244_v10 = vld [vmem:[%s456_s2] ss:$0 sm:$0xff]  ;;  %p338_p2 = scmp.ne.s32.totalorder %s225_s23, %s337_s24  ;;  %p343_p4 = scmp.lt.s32.totalorder %s337_s24, %s337_s24 }
  0x2b   :  { %v245_v34 = vld [vmem:[%s457_s3] ss:$0 sm:$0xff] }
  0x2c   :  { %v246_v36 = vld [vmem:[%s458_s4] ss:$0 sm:$0xff]  ;;  %p344_p5 = por %p343_p4, %p342_p3 }
  0x2e   :  { %p345_p6 = pnand %p344_p5, %p338_p2 }
  0x30   :  { %259 = vmatpush3.bf16.xpose.msra.mxu0 %v284_v2 }
  0x31   :  { %260 = vmatprep.subr.bf16.mxu0 %v369_v0 }
  0x38   :  { %261 = vmatpush3.bf16.xpose.msra.mxu0 %v285_v3 }
  0x39   :  { %262 = vmatprep.subr.bf16.mxu0 %v369_v0 }
  0x40   :  { %263 = vmatpush3.bf16.xpose.msra.mxu0 %v286_v4 }
  0x41   :  { %264 = vmatprep.subr.bf16.mxu0 %v369_v0 }
  0x48   :  { %265 = vmatpush3.bf16.xpose.msra.mxu0 %v287_v5 }
  0x49   :  { %266 = vmatprep.subr.bf16.mxu0 %v369_v0 }
  0x50   :  { %267 = vmatpush3.bf16.xpose.msra.mxu0 %v288_v6 }
  0x51   :  { %268 = vmatprep.subr.bf16.mxu0 %v369_v0 }
  0x58   :  { %269 = vmatpush3.bf16.xpose.msra.mxu0 %v289_v7 }
  0x59   :  { %270 = vmatprep.subr.bf16.mxu0 %v369_v0 }
  0x60   :  { %271 = vmatpush3.bf16.xpose.msra.mxu0 %v290_v8 }
  0x67   :  { %273 = vmatmul.mubr.bf16.vlgmr.msra.gmra.mrb[0].mxu0 %v58_v9 }
 0x13a   :  { %v158_v11 = vpop.f32.mrb[0].mxu0 }
 0x13b   :  { %v177_v12 = vadd.f32 %v244_v10, %v158_v11  ;;  %v274_v13 = vpop.f32.mrb[1].mxu0 }
 0x13c   :  { %v161_v14 = vpop.f32.mrb[2].mxu0 }
 0x13d   :  { %v178_v15 = vrot.slane %v177_v12, 4  ;;  %v275_v16 = vpop.f32.mrb[3].mxu0 }
 0x13f   :  { %v179_v17 = vadd.f32 %v178_v15, %v177_v12 }
 0x141   :  { %v180_v18 = vrot.slane %v179_v17, 2 }
 0x143   :  { %v181_v19 = vadd.f32 %v180_v18, %v179_v17 }
 0x145   :  { %v182_v20 = vrot.slane %v181_v19, 1 }
 0x147   :  { %v183_v21 = vadd.f32 %v182_v20, %v181_v19 }
 0x149   :  { %v185_v22 = vmul.f32 0.125, %v183_v21 }
 0x14b   :  { %v186_v23 = vsub.f32 %v177_v12, %v185_v22 }
 0x14d   :  { %v187_v24 = vmul.f32 %v186_v23, %v186_v23 }
 0x14f   :  { %v188_v25 = vrot.slane %v187_v24, 4 }
 0x151   :  { %v189_v26 = vadd.f32 %v188_v25, %v187_v24 }
 0x153   :  { %v190_v27 = vrot.slane %v189_v26, 2 }
 0x155   :  { %v191_v28 = vadd.f32 %v190_v27, %v189_v26 }
 0x157   :  { %v192_v29 = vrot.slane %v191_v28, 1 }
 0x159   :  { %v193_v30 = vadd.f32 %v192_v29, %v191_v28 }
 0x15b   :  { %v194_v31 = vmul.f32 0.125, %v193_v30 }
 0x15d   :  { %v195_v32 = vadd.f32 1e-05, %v194_v31 }
 0x15f   :  { %291 = vrsqrt.f32 %v195_v32 }
 0x169   :  { %v292_v33 = vpop.eup %291 }
 0x16a   :  { %v197_v35 = vmul.f32 %v292_v33, %v186_v23 }
 0x16c   :  { %v205_v37 = vmul.f32 %v245_v34, %v197_v35 }
 0x16e   :  { %v213_v38 = vadd.f32 %v246_v36, %v205_v37 }
 0x170   :  { %vm214_vm1 = vcmp.gt.f32.partialorder %v213_v38, 0.0  ;;  %v215_v39 = vmul.f32 0.2, %v213_v38 }
 0x172   :  { %v216_v40 = vsel %vm214_vm1, %v213_v38, %v215_v39 }
 0x173   :  { %217 = vst [vmem:[#allocation8] sm:$0xff] %v216_v40 }
 0x174   :  { %348 = shalt.err (!%p345_p6)
}
 0x175   :  { %s349_s4 = scalar_lea.hbm %s459_s5, 128 }
 0x176   :  { %p350_p7 = scmp.ne.s32.totalorder %s459_s5, %s349_s4  ;;  %p353_p8 = scmp.lt.u32.totalorder %s349_s4, %s459_s5 }
 0x178   :  { %p355_p9 = pnand %p353_p8, %p350_p7 }
 0x17a   :  { %358 = shalt.err (!%p355_p9)
}
 0x17b   :  { %227 = dma.vmem_to_hbm [thread:$0]  %s225_s23, 128, %s459_s5, [#allocation5]  }
 0x17c   :  { %363 = dma.done.wait [#allocation5], 128  }
 0x17d   :  { %364 = vsyncadd [#allocation5], 4294967168 }
 0x17e   :  { %231 = vsyncpa [#allocation4], 1 }
 0x17f   :  { %232 = vsyncpa [#allocation7], 1 }
 0x180   :  { %233 = vsyncpa [#allocation5], 1 }

</bundles_post_ra>
